<compile_context>
chip_gen: v5e
topology: v5e:2x2
jax: 0.10.0
libtpu: 0.0.40
codegen_flags: <defaults>
</compile_context>

<pallas_src>
import functools
import math

import jax
import jax.numpy as jnp
from jax import lax
from jax.experimental import pallas as pl
from jax.experimental.pallas import tpu as pltpu

_INV_SQRT2 = 1.0 / math.sqrt(2.0)


def _round_up(x, m):
    return ((x + m - 1) // m) * m


def _gelu_exact_f32(z):
    # exact GELU: 0.5 * z * (1 + erf(z / sqrt(2))), computed in f32
    return 0.5 * z * (1.0 + lax.erf(z * _INV_SQRT2))


def _vmem_capacity_bytes():
    """Physical per-TensorCore VMEM (128 MiB on v5e/v6e, 64 MiB on v7x)."""
    try:
        cap = getattr(pltpu.get_tpu_info(), "vmem_capacity_bytes", None)
        if cap:
            return int(cap)
    except Exception:
        pass
    return 64 << 20  # conservative default (v7x per-TC)


# ---------------------------------------------------------------------------
# Kernels
# ---------------------------------------------------------------------------

def _mlp_resident_kernel(x_ref, w_ref, b_ref, o_ref, *, num_layers):
    """Small-dim plan: the whole (L, dim, dim) weight stack is VMEM-resident.

    grid = (num_m_tiles,). One grid step runs ALL layers on one (tm, dim)
    activation tile, so the ~600-cycle per-grid-step overhead is paid once per
    M tile instead of once per (M tile, layer), and weights are DMA'd once.
    """
    h = x_ref[...].astype(jnp.float32)

    def layer_body(l, h):
        # MXU sees matmul_dtype (bf16) operands, accumulates in f32.
        z = jnp.dot(h.astype(w_ref.dtype), w_ref[l],
                    preferred_element_type=jnp.float32)
        z = z + b_ref[l].astype(jnp.float32)
        return _gelu_exact_f32(z)

    h = lax.fori_loop(0, num_layers, layer_body, h,
                      unroll=(num_layers <= 8))
    o_ref[...] = h.astype(o_ref.dtype)


def _mlp_streamed_kernel(x_ref, w_ref, b_ref, o_ref):
    """Large-dim plan: grid = (num_m_tiles, num_layers); weights streamed.

    The layer axis is sequential ("arbitrary"); the f32 output block is
    VMEM-resident across it and doubles as the layer-to-layer activation
    buffer (no scratch, no HBM round-trip between layers).
    """
    layer = pl.program_id(1)

    @pl.when(layer == 0)
    def _():
        o_ref[...] = x_ref[...].astype(o_ref.dtype)

    z = jnp.dot(o_ref[...].astype(w_ref.dtype), w_ref[0],
                preferred_element_type=jnp.float32)
    z = z + b_ref[0].astype(jnp.float32)
    o_ref[...] = _gelu_exact_f32(z).astype(o_ref.dtype)


# ---------------------------------------------------------------------------
# Wrapper
# ---------------------------------------------------------------------------

def mlp_forward(x, weights, biases, *, matmul_dtype=jnp.bfloat16, tm_max=512,
                plan="auto"):
    """Fused MLP forward.

    x:       (M, dim)
    weights: (L, dim, dim)  -- pre-transposed; layer l computes h @ weights[l]
    biases:  (L, 1, dim)
    matmul_dtype: dtype fed to the MXU (bf16 = native throughput; accumulation
                  is always f32). Use jnp.float32 for bit-faithful validation.
    plan: "auto" | "resident" | "streamed"
    """
    M, dim = x.shape
    L = weights.shape[0]
    assert weights.shape == (L, dim, dim) and biases.shape == (L, 1, dim)

    out_dtype = x.dtype
    x = x.astype(jnp.float32)

    # --- padding to TPU tile alignment ------------------------------------
    # Lane dim multiple of 128; rows multiple of 8. Zero padding is exact
    # (zero weight cols + zero bias + gelu(0) == 0 keep padded cols zero).
    # TODO(synk): round dim_p to 256 on v6e/v7x (2x256x256 MXU) for large dim.
    dim_p = _round_up(dim, 128)
    m8 = _round_up(M, 8)

    w = weights.astype(matmul_dtype)      # bf16 in HBM -> half the DMA traffic
    b = biases.astype(jnp.float32)
    if dim_p != dim:
        w = jnp.pad(w, ((0, 0), (0, dim_p - dim), (0, dim_p - dim)))
        b = jnp.pad(b, ((0, 0), (0, 0), (0, dim_p - dim)))

    w_isz = jnp.dtype(matmul_dtype).itemsize
    vmem_cap = _vmem_capacity_bytes()
    budget = int(vmem_cap * 0.85)         # headroom for Mosaic temporaries

    # --- plan selection ----------------------------------------------------
    resident_w_bytes = 2 * L * dim_p * dim_p * w_isz   # conservative (2 bufs)
    if plan == "auto":
        use_resident = (dim_p <= 1024) and (resident_w_bytes <= budget // 2)
    else:
        use_resident = (plan == "resident")

    def act_bytes(tm):
        return (2 * tm * dim_p * 4        # x tile (double-buffered, f32)
                + 2 * tm * dim_p * 4      # resident f32 output/activation block
                + 2 * tm * dim_p * 4)     # z / erf epilogue temporaries headroom

    if use_resident:
        # No weight re-streaming, so splitting M is nearly free: make >= 2 M
        # tiles when possible so v7x's two TensorCores both get work.
        tm = min(tm_max, m8)
        if m8 >= 16:
            tm = min(tm, _round_up(pl.cdiv(m8, 2), 8))
        fixed_bytes = resident_w_bytes + 2 * L * dim_p * 4
        while tm > 8 and fixed_bytes + act_bytes(tm) > budget:
            tm = _round_up(max(tm // 2, 8), 8)
    else:
        # Weights are streamed once per (layer, M tile): keep tm large so each
        # (dim_p, dim_p) weight block is reused over many rows (v6e roofline).
        tm = min(tm_max, m8)
        fixed_bytes = 2 * dim_p * dim_p * w_isz + 2 * dim_p * 4
        while tm > 8 and fixed_bytes + act_bytes(tm) > budget:
            tm = _round_up(max(tm // 2, 8), 8)
        # TODO(synk): N-tile the weight block when 2*dim_p^2*w_isz alone
        # exceeds the VMEM budget (dim_p >~ 3.7K bf16 on v7x).

    m_p = _round_up(m8, tm)
    num_m_tiles = m_p // tm
    if m_p != M or dim_p != dim:
        x = jnp.pad(x, ((0, m_p - M), (0, dim_p - dim)))

    vmem_need = fixed_bytes + act_bytes(tm)
    vmem_limit = int(min(max(vmem_need + (8 << 20), 32 << 20), vmem_cap))

    w_hbm_reads = 1 if use_resident else num_m_tiles
    cost = pl.CostEstimate(
        flops=2 * m_p * dim_p * dim_p * L,
        transcendentals=m_p * dim_p * L,
        bytes_accessed=(m_p * dim_p * 4
                        + L * dim_p * dim_p * w_isz * w_hbm_reads
                        + L * dim_p * 4 * w_hbm_reads
                        + m_p * dim_p * 4),
    )

    if use_resident:
        kernel = functools.partial(_mlp_resident_kernel, num_layers=L)
        grid = (num_m_tiles,)
        in_specs = [
            pl.BlockSpec((tm, dim_p), lambda i: (i, 0)),
            pl.BlockSpec((L, dim_p, dim_p), lambda i: (0, 0, 0)),
            pl.BlockSpec((L, 1, dim_p), lambda i: (0, 0, 0)),
        ]
        out_specs = pl.BlockSpec((tm, dim_p), lambda i: (i, 0))
        dim_sem = ("parallel",)
    else:
        kernel = _mlp_streamed_kernel
        grid = (num_m_tiles, L)
        in_specs = [
            pl.BlockSpec((tm, dim_p), lambda i, l: (i, 0)),
            pl.BlockSpec((1, dim_p, dim_p), lambda i, l: (l, 0, 0)),
            pl.BlockSpec((1, 1, dim_p), lambda i, l: (l, 0, 0)),
        ]
        out_specs = pl.BlockSpec((tm, dim_p), lambda i, l: (i, 0))
        # Layer axis must stay sequential: the output block carries activations.
        dim_sem = ("parallel", "arbitrary")

    out = pl.pallas_call(
        kernel,
        out_shape=jax.ShapeDtypeStruct((m_p, dim_p), jnp.float32),
        grid_spec=pltpu.PrefetchScalarGridSpec(
            num_scalar_prefetch=0,
            grid=grid,
            in_specs=in_specs,
            out_specs=out_specs,
        ),
        compiler_params=pltpu.CompilerParams(
            dimension_semantics=dim_sem,
            vmem_limit_bytes=vmem_limit,
        ),
        cost_estimate=cost,
    )(x, w, b)

    return out[:M, :dim].astype(out_dtype)


# ---------------------------------------------------------------------------
# Init + reference
# ---------------------------------------------------------------------------

def init_mlp_params(key, dim, num_layers, dtype=jnp.float32):
    """Mimics nn.Linear init: U(-1/sqrt(dim), 1/sqrt(dim)); weights stored
    pre-transposed as (in_dim, out_dim)."""
    bound = 1.0 / math.sqrt(dim)
    ws, bs = [], []
    for _ in range(num_layers):
        kw, kb, key = jax.random.split(key, 3)
        ws.append(jax.random.uniform(kw, (dim, dim), dtype, minval=-bound, maxval=bound))
        bs.append(jax.random.uniform(kb, (1, dim), dtype, minval=-bound, maxval=bound))
    return jnp.stack(ws), jnp.stack(bs)   # (L, dim, dim), (L, 1, dim)


def mlp_reference(x, weights, biases):
    """Pure-JAX f32 reference (exact erf GELU)."""
    for l in range(weights.shape[0]):
        z = x @ weights[l] + biases[l]
        x = 0.5 * z * (1.0 + lax.erf(z * _INV_SQRT2))
    return x


if __name__ == "__main__":
    batch, dim, num_layers = 8, 128, 3

    key = jax.random.PRNGKey(0)
    kx, kp = jax.random.split(key)
    x = jax.random.normal(kx, (batch, dim), jnp.float32)
    weights, biases = init_mlp_params(kp, dim, num_layers)

    ref = mlp_reference(x, weights, biases)

    # Production path: bf16 MXU operands, f32 accumulation (resident-weight plan).
    out = jax.block_until_ready(mlp_forward(x, weights, biases))
    assert out.shape == (batch, dim) and out.dtype == x.dtype
    assert jnp.allclose(out, ref, atol=2e-2, rtol=2e-2), "bf16 path mismatch vs reference"

    # f32-MXU validation path (tight tolerance vs. exact reference).
    out_f32 = jax.block_until_ready(
        mlp_forward(x, weights, biases, matmul_dtype=jnp.float32))
    assert jnp.allclose(out_f32, ref, atol=1e-5, rtol=1e-5), "f32 path mismatch vs reference"

    # Also exercise the streamed (large-dim) plan at the small demo shape.
    out_s = jax.block_until_ready(
        mlp_forward(x, weights, biases, plan="streamed"))
    assert jnp.allclose(out_s, ref, atol=2e-2, rtol=2e-2), "streamed path mismatch vs reference"

    print("KERNEL_OK")
</pallas_src>

<mosaic_0001>
module attributes {stable_mosaic.version = 11 : i64} {
  func.func @_mlp_resident_kernel(%arg0: i32, %arg1: memref<8x128xf32, #tpu.memory_space<vmem>>, %arg2: memref<3x128x128xbf16, #tpu.memory_space<vmem>>, %arg3: memref<3x1x128xf32, #tpu.memory_space<vmem>>, %arg4: memref<8x128xf32, #tpu.memory_space<vmem>>) attributes {dimension_semantics = [#tpu.dimension_semantics<parallel>], iteration_bounds = array<i64: 1>, scalar_prefetch = 0 : i64, scratch_operands = 0 : i64, tpu.core_type = #tpu.core_type<tc>, window_params = [{transform_indices = @transform_0, window_bounds = array<i64: 8, 128>}, {pipeline_mode = #tpu.pipeline_mode<synchronous>, transform_indices = @transform_1, window_bounds = array<i64: 3, 128, 128>}, {pipeline_mode = #tpu.pipeline_mode<synchronous>, transform_indices = @transform_2, window_bounds = array<i64: 3, 1, 128>}, {transform_indices = @transform_3, window_bounds = array<i64: 8, 128>}]} {
    %c0 = arith.constant 0 : index
    %c0_0 = arith.constant 0 : index
    %0 = vector.load %arg1[%c0, %c0_0] : memref<8x128xf32, #tpu.memory_space<vmem>>, vector<8x128xf32>
    %c0_i32 = arith.constant 0 : i32
    %1 = arith.truncf %0 : vector<8x128xf32> to vector<8x128xbf16>
    %2 = arith.index_cast %c0_i32 : i32 to index
    %c0_1 = arith.constant 0 : index
    %c0_2 = arith.constant 0 : index
    %3 = vector.load %arg2[%2, %c0_1, %c0_2] : memref<3x128x128xbf16, #tpu.memory_space<vmem>>, vector<1x128x128xbf16>
    %4 = vector.shape_cast %3 : vector<1x128x128xbf16> to vector<128x128xbf16>
    %cst = arith.constant dense<0.000000e+00> : vector<8x128xf32>
    %5 = tpu.matmul %1, %4, %cst {dimension_numbers = #tpu.dot_dimension_numbers<[1], [0], [0], [1], [0, 0, 1, 1], [], []>} : vector<8x128xbf16>, vector<128x128xbf16>, vector<8x128xf32> -> vector<8x128xf32>
    %6 = arith.index_cast %c0_i32 : i32 to index
    %c0_3 = arith.constant 0 : index
    %c0_4 = arith.constant 0 : index
    %7 = vector.load %arg3[%6, %c0_3, %c0_4] : memref<3x1x128xf32, #tpu.memory_space<vmem>>, vector<1x1x128xf32>
    %8 = vector.shape_cast %7 : vector<1x1x128xf32> to vector<1x128xf32>
    %9 = vector.broadcast %8 : vector<1x128xf32> to vector<8x128xf32>
    %10 = arith.addf %5, %9 : vector<8x128xf32>
    %cst_5 = arith.constant 5.000000e-01 : f32
    %11 = vector.broadcast %cst_5 : f32 to vector<8x128xf32>
    %12 = arith.mulf %11, %10 : vector<8x128xf32>
    %cst_6 = arith.constant 0.707106769 : f32
    %13 = vector.broadcast %cst_6 : f32 to vector<8x128xf32>
    %14 = arith.mulf %10, %13 : vector<8x128xf32>
    %15 = math.erf %14 : vector<8x128xf32>
    %cst_7 = arith.constant 1.000000e+00 : f32
    %16 = vector.broadcast %cst_7 : f32 to vector<8x128xf32>
    %17 = arith.addf %16, %15 : vector<8x128xf32>
    %18 = arith.mulf %12, %17 : vector<8x128xf32>
    %c1_i32 = arith.constant 1 : i32
    %19 = arith.truncf %18 : vector<8x128xf32> to vector<8x128xbf16>
    %20 = arith.index_cast %c1_i32 : i32 to index
    %c0_8 = arith.constant 0 : index
    %c0_9 = arith.constant 0 : index
    %21 = vector.load %arg2[%20, %c0_8, %c0_9] : memref<3x128x128xbf16, #tpu.memory_space<vmem>>, vector<1x128x128xbf16>
    %22 = vector.shape_cast %21 : vector<1x128x128xbf16> to vector<128x128xbf16>
    %cst_10 = arith.constant dense<0.000000e+00> : vector<8x128xf32>
    %23 = tpu.matmul %19, %22, %cst_10 {dimension_numbers = #tpu.dot_dimension_numbers<[1], [0], [0], [1], [0, 0, 1, 1], [], []>} : vector<8x128xbf16>, vector<128x128xbf16>, vector<8x128xf32> -> vector<8x128xf32>
    %24 = arith.index_cast %c1_i32 : i32 to index
    %c0_11 = arith.constant 0 : index
    %c0_12 = arith.constant 0 : index
    %25 = vector.load %arg3[%24, %c0_11, %c0_12] : memref<3x1x128xf32, #tpu.memory_space<vmem>>, vector<1x1x128xf32>
    %26 = vector.shape_cast %25 : vector<1x1x128xf32> to vector<1x128xf32>
    %27 = vector.broadcast %26 : vector<1x128xf32> to vector<8x128xf32>
    %28 = arith.addf %23, %27 : vector<8x128xf32>
    %cst_13 = arith.constant 5.000000e-01 : f32
    %29 = vector.broadcast %cst_13 : f32 to vector<8x128xf32>
    %30 = arith.mulf %29, %28 : vector<8x128xf32>
    %cst_14 = arith.constant 0.707106769 : f32
    %31 = vector.broadcast %cst_14 : f32 to vector<8x128xf32>
    %32 = arith.mulf %28, %31 : vector<8x128xf32>
    %33 = math.erf %32 : vector<8x128xf32>
    %cst_15 = arith.constant 1.000000e+00 : f32
    %34 = vector.broadcast %cst_15 : f32 to vector<8x128xf32>
    %35 = arith.addf %34, %33 : vector<8x128xf32>
    %36 = arith.mulf %30, %35 : vector<8x128xf32>
    %c2_i32 = arith.constant 2 : i32
    %37 = arith.truncf %36 : vector<8x128xf32> to vector<8x128xbf16>
    %38 = arith.index_cast %c2_i32 : i32 to index
    %c0_16 = arith.constant 0 : index
    %c0_17 = arith.constant 0 : index
    %39 = vector.load %arg2[%38, %c0_16, %c0_17] : memref<3x128x128xbf16, #tpu.memory_space<vmem>>, vector<1x128x128xbf16>
    %40 = vector.shape_cast %39 : vector<1x128x128xbf16> to vector<128x128xbf16>
    %cst_18 = arith.constant dense<0.000000e+00> : vector<8x128xf32>
    %41 = tpu.matmul %37, %40, %cst_18 {dimension_numbers = #tpu.dot_dimension_numbers<[1], [0], [0], [1], [0, 0, 1, 1], [], []>} : vector<8x128xbf16>, vector<128x128xbf16>, vector<8x128xf32> -> vector<8x128xf32>
    %42 = arith.index_cast %c2_i32 : i32 to index
    %c0_19 = arith.constant 0 : index
    %c0_20 = arith.constant 0 : index
    %43 = vector.load %arg3[%42, %c0_19, %c0_20] : memref<3x1x128xf32, #tpu.memory_space<vmem>>, vector<1x1x128xf32>
    %44 = vector.shape_cast %43 : vector<1x1x128xf32> to vector<1x128xf32>
    %45 = vector.broadcast %44 : vector<1x128xf32> to vector<8x128xf32>
    %46 = arith.addf %41, %45 : vector<8x128xf32>
    %cst_21 = arith.constant 5.000000e-01 : f32
    %47 = vector.broadcast %cst_21 : f32 to vector<8x128xf32>
    %48 = arith.mulf %47, %46 : vector<8x128xf32>
    %cst_22 = arith.constant 0.707106769 : f32
    %49 = vector.broadcast %cst_22 : f32 to vector<8x128xf32>
    %50 = arith.mulf %46, %49 : vector<8x128xf32>
    %51 = math.erf %50 : vector<8x128xf32>
    %cst_23 = arith.constant 1.000000e+00 : f32
    %52 = vector.broadcast %cst_23 : f32 to vector<8x128xf32>
    %53 = arith.addf %52, %51 : vector<8x128xf32>
    %54 = arith.mulf %48, %53 : vector<8x128xf32>
    %c3_i32 = arith.constant 3 : i32
    %c0_24 = arith.constant 0 : index
    %c0_25 = arith.constant 0 : index
    %55 = vector.load %arg4[%c0_24, %c0_25] : memref<8x128xf32, #tpu.memory_space<vmem>>, vector<8x128xf32>
    tpu.vector_store %arg4[%c0_24, %c0_25], %54 {strides = array<i32>} : memref<8x128xf32, #tpu.memory_space<vmem>>, vector<8x128xf32>,
    return
  }
  func.func @transform_0(%arg0: i32) -> (i32, i32) {
    %c0_i32 = arith.constant 0 : i32
    %c0_i32_0 = arith.constant 0 : i32
    return %arg0, %c0_i32 : i32, i32
  }
  func.func @transform_1(%arg0: i32) -> (i32, i32, i32) {
    %c0_i32 = arith.constant 0 : i32
    %c0_i32_0 = arith.constant 0 : i32
    %c0_i32_1 = arith.constant 0 : i32
    %c0_i32_2 = arith.constant 0 : i32
    return %c0_i32, %c0_i32_0, %c0_i32_1 : i32, i32, i32
  }
  func.func @transform_2(%arg0: i32) -> (i32, i32, i32) {
    %c0_i32 = arith.constant 0 : i32
    %c0_i32_0 = arith.constant 0 : i32
    %c0_i32_1 = arith.constant 0 : i32
    %c0_i32_2 = arith.constant 0 : i32
    return %c0_i32, %c0_i32_0, %c0_i32_1 : i32, i32, i32
  }
  func.func @transform_3(%arg0: i32) -> (i32, i32) {
    %c0_i32 = arith.constant 0 : i32
    %c0_i32_0 = arith.constant 0 : i32
    return %arg0, %c0_i32 : i32, i32
  }
}

</mosaic_0001>

<bundles_post_ra>
// kernel: tpu_custom_call.1
= control target key start
LH: loop header
LB: loop body
LE: loop exit
PB: predicated region body
PF: predicated region fallthrough
CT: control target
= control target key end

     0   :  { %8 = vsyncpa [#allocation3], 0  ;;  %s744_s0 = inlined_call_operand.hbm [shape: f32[8,128], index: 0, kind: input, shape index: {}]   ;;  %s745_s1 = inlined_call_operand.hbm [shape: bf16[3,128,128], index: 1, kind: input, shape index: {}]   ;;  %s746_s2 = inlined_call_operand.hbm [shape: f32[3,1,128], index: 2, kind: input, shape index: {}]   ;;  %s747_s3 = inlined_call_operand.hbm [shape: f32[8,128], index: 3, kind: output, shape index: {}]  }
   0x1   :  { %9 = vsyncpa [#allocation6], 0  ;;  %s26_s14 = sshll.u32 %s745_s1, 4  ;;  %s27_s14 = int_to_ptr.hbm [resolvable:$true] %s26_s14 }
   0x2   :  { %10 = vsyncpa [#allocation4], 0  ;;  %s704_s15 = smov [#allocation5]   ;;  %s16_s19 = sshll.u32 %s744_s0, 4  ;;  %s17_s19 = int_to_ptr.hbm [resolvable:$true] %s16_s19 }
   0x3   :  { %s28_s16 = sshll.u32 %s704_s15, 4  ;;  %s705_s20 = smov 64   ;;  %s29_s16 = int_to_ptr.vmem [resolvable:$true] %s28_s16 }
   0x4   :  { %s706_s21 = smov 4   ;;  %s707_s22 = smov [#allocation2]  }
   0x5   :  { %34 = dma.hbm_to_vmem [thread:$0]  %s27_s14, 3072, %s29_s16, [#allocation6], %s705_s20, %s705_s20, %s706_s21  }
   0x6   :  { %s18_s23 = sshll.u32 %s707_s22, 4  ;;  %s39_s26 = sshll.u32 %s746_s2, 4  ;;  %s19_s23 = int_to_ptr.vmem [resolvable:$true] %s18_s23  ;;  %s40_s26 = int_to_ptr.hbm [resolvable:$true] %s39_s26 }
   0x7   :  { %21 = dma.hbm_to_vmem [thread:$0]  %s17_s19, 128, %s19_s23, [#allocation3]  }
   0x8   :  { %s708_s1 = smov [#allocation7]   ;;  %s709_s28 = smov 16  }
   0x9   :  { %s41_s27 = sshll.u32 %s708_s1, 4  ;;  %s710_s29 = smov 1   ;;  %s42_s27 = int_to_ptr.vmem [resolvable:$true] %s41_s27 }
   0xa   :  { %47 = dma.hbm_to_vmem [thread:$0]  %s40_s26, 48, %s42_s27, [#allocation6], %s709_s28, %s709_s28, %s710_s29  }
   0xb   :  { %698 = dma.done.wait [#allocation3], 128  }
   0xc   :  { %699 = vsyncadd [#allocation3], 4294967168 }
   0xd   :  { %700 = dma.done.wait [#allocation6], 3120  }
   0xe   :  { %701 = vsyncadd [#allocation6], 4294964176  ;;  %v568_v0 = vld [vmem:[#allocation5 + $0x38] sm:$0xff]  ;;  %v567_v1 = vld [vmem:[#allocation5 + $0x30] sm:$0xff]  ;;  %s711_s0 = smov [#allocation8]   ;;  %s451_s5 = sshll.u32 %s747_s3, 4  ;;  %s452_s5 = int_to_ptr.hbm [resolvable:$true] %s451_s5 }
   0xf   :  { %130 = vmatpush.bf16.msra.mxu0 %v568_v0  ;;  %v566_v2 = vld [vmem:[#allocation5 + $0x28] sm:$0xff]  ;;  %v565_v3 = vld [vmem:[#allocation5 + $0x20] sm:$0xff]  ;;  %v564_v4 = vld [vmem:[#allocation5 + $0x18] sm:$0xff]  ;;  %s449_s2 = sshll.u32 %s711_s0, 4  ;;  %s450_s2 = int_to_ptr.vmem [resolvable:$true] %s449_s2 }
  0x10   :  { %v563_v5 = vld [vmem:[#allocation5 + $0x10] sm:$0xff]  ;;  %v562_v6 = vld [vmem:[#allocation5 + $0x8] sm:$0xff]  ;;  %v561_v7 = vld [vmem:[#allocation5] sm:$0xff] }
  0x11   :  { %v60_v8 = vld [vmem:[#allocation2] sm:$0xff]  ;;  %v575_v11 = vld [vmem:[#allocation5 + $0x70] sm:$0xff]  ;;  %v593_v12 = vld [vmem:[#allocation7] ss:$0 sm:$0xff] }
  0x12   :  { %v61_v9 = vpack.c.bf16 %v60_v8, %v60_v8  ;;  %v576_v10 = vld [vmem:[#allocation5 + $0x78] sm:$0xff]  ;;  %v574_v13 = vld [vmem:[#allocation5 + $0x68] sm:$0xff]  ;;  %v573_v16 = vld [vmem:[#allocation5 + $0x60] sm:$0xff] }
  0x13   :  { %131 = vmatpush.bf16.msra.mxu0 %v567_v1  ;;  %258 = vmatpush.bf16.msra.mxu1 %v576_v10  ;;  %v572_v19 = vld [vmem:[#allocation5 + $0x58] sm:$0xff]  ;;  %v571_v23 = vld [vmem:[#allocation5 + $0x50] sm:$0xff]  ;;  %v570_v28 = vld [vmem:[#allocation5 + $0x48] sm:$0xff] }
  0x14   :  { %v569_v32 = vld [vmem:[#allocation5 + $0x40] sm:$0xff]  ;;  %v584_v62 = vld [vmem:[#allocation5 + $0xb8] sm:$0xff]  ;;  %v583_v63 = vld [vmem:[#allocation5 + $0xb0] sm:$0xff] }
  0x15   :  { %386 = vmatpush.bf16.msra.mxu2 %v584_v62  ;;  %v594_v0 = vld [vmem:[#allocation7 + $0x1] ss:$0 sm:$0xff]  ;;  %v582_v1 = vld [vmem:[#allocation5 + $0xa8] sm:$0xff] }
  0x17   :  { %132 = vmatpush.bf16.msra.mxu0 %v566_v2  ;;  %259 = vmatpush.bf16.msra.mxu1 %v575_v11 }
  0x19   :  { %387 = vmatpush.bf16.msra.mxu2 %v583_v63 }
  0x1b   :  { %133 = vmatpush.bf16.msra.mxu0 %v565_v3  ;;  %260 = vmatpush.bf16.msra.mxu1 %v574_v13 }
  0x1d   :  { %388 = vmatpush.bf16.msra.mxu2 %v582_v1 }
  0x1f   :  { %134 = vmatpush.bf16.msra.mxu0 %v564_v4  ;;  %261 = vmatpush.bf16.msra.mxu1 %v573_v16  ;;  %v581_v4 = vld [vmem:[#allocation5 + $0xa0] sm:$0xff] }
  0x21   :  { %389 = vmatpush.bf16.msra.mxu2 %v581_v4 }
  0x23   :  { %135 = vmatpush.bf16.msra.mxu0 %v563_v5  ;;  %262 = vmatpush.bf16.msra.mxu1 %v572_v19 }
  0x27   :  { %136 = vmatpush.bf16.msra.mxu0 %v562_v6  ;;  %263 = vmatpush.bf16.msra.mxu1 %v571_v23 }
  0x2b   :  { %137 = vmatpush.bf16.msra.mxu0 %v561_v7  ;;  %264 = vmatpush.bf16.msra.mxu1 %v570_v28  ;;  %v580_v7 = vld [vmem:[#allocation5 + $0x98] sm:$0xff] }
  0x2c   :  { %390 = vmatpush.bf16.msra.mxu2 %v580_v7 }
  0x2e   :  { %138 = vmatmul.bf16.vlgmr.msra.gmra.mxu0 %v61_v9 }
  0x2f   :  { %265 = vmatpush.bf16.msra.mxu1 %v569_v32 }
  0xab   :  { %v139_v14 = vpop.f32.mrf.mxu0 }
  0xac   :  { %v140_v15 = vadd.f32 %v593_v12, %v139_v14  ;;  %v579_v12 = vld [vmem:[#allocation5 + $0x90] sm:$0xff] }
  0xad   :  { %391 = vmatpush.bf16.msra.mxu2 %v579_v12 }
  0xae   :  { %v144_v17 = vmul.f32 0.70710677, %v140_v15  ;;  %v143_v58 = vmul.f32 0.5, %v140_v15 }
  0xb0   :  { %v145_v18 = vmul.f32 %v144_v17, %v144_v17 }
  0xb2   :  { %v146_v20 = vmin.f32 %v145_v18, 16.0 }
  0xb3   :  { %v141_v21 = vpop.f32.mrf.mxu0 }
  0xb4   :  { %v147_v22 = vmul.f32 2.1237322e-06, %v146_v20  ;;  %v158_v24 = vmul.f32 3.8918573e-05, %v146_v20  ;;  %v577_v21 = vld [vmem:[#allocation5 + $0x80] sm:$0xff] }
  0xb6   :  { %v148_v25 = vadd.f32 0.00028619796, %v147_v22  ;;  %v159_v26 = vadd.f32 0.001143296, %v158_v24 }
  0xb8   :  { %v149_v27 = vmul.f32 %v148_v25, %v146_v20  ;;  %v160_v29 = vmul.f32 %v159_v26, %v146_v20 }
  0xba   :  { %v161_v30 = vadd.f32 0.014752088, %v160_v29  ;;  %v150_v31 = vadd.f32 0.0036580483, %v149_v27 }
  0xbc   :  { %v162_v33 = vmul.f32 %v161_v30, %v146_v20  ;;  %v151_v35 = vmul.f32 %v150_v31, %v146_v20 }
  0xbe   :  { %v163_v34 = vadd.f32 0.112945676, %v162_v33  ;;  %v152_v38 = vadd.f32 0.05243302, %v151_v35 }
  0xc0   :  { %v164_v36 = vmul.f32 %v163_v34, %v146_v20  ;;  %v153_v41 = vmul.f32 %v152_v38, %v146_v20 }
  0xc2   :  { %v165_v37 = vadd.f32 0.4994258, %v164_v36  ;;  %v154_v42 = vadd.f32 0.18741608, %v153_v41 }
  0xc4   :  { %v166_v39 = vmul.f32 %v165_v37, %v146_v20  ;;  %v155_v44 = vmul.f32 %v154_v42, %v146_v20 }
  0xc6   :  { %v167_v40 = vadd.f32 1.0, %v166_v39  ;;  %v156_v48 = vadd.f32 1.1283791, %v155_v44 }
  0xc8   :  { %596 = vrcp.f32 %v167_v40  ;;  %v179_v47 = vand.u32 2147483648, %v167_v40  ;;  %v177_v50 = vand.u32 2147483647, %v167_v40  ;;  %vm173_vm1 = vweird.f32 %v167_v40 }
  0xc9   :  { %v157_v53 = vmul.f32 %v156_v48, %v144_v17  ;;  %v578_v17 = vld [vmem:[#allocation5 + $0x88] sm:$0xff] }
  0xca   :  { %v180_v52 = vor.u32 1.1754944e-38, %v179_v47  ;;  %vm178_vm3 = vcmp.eq.f32.partialorder %v177_v50, 8.507059e+37  ;;  %392 = vmatpush.bf16.msra.mxu2 %v578_v17  ;;  %v595_v50 = vld [vmem:[#allocation7 + $0x2] ss:$0 sm:$0xff] }
  0xce   :  { %v597_v43 = vpop.eup %596  ;;  %393 = vmatpush.bf16.msra.mxu2 %v577_v21 }
  0xcf   :  { %v169_v45 = vmul.f32 %v597_v43, %v167_v40  ;;  %vm174_vm0 = vweird.f32 %v597_v43 }
  0xd0   :  { %vm175_vm2 = vmor %vm173_vm1, %vm174_vm0 }
  0xd1   :  { %v170_v46 = vsub.f32 1.0, %v169_v45 }
  0xd3   :  { %v171_v49 = vmul.f32 %v597_v43, %v170_v46 }
  0xd5   :  { %v172_v51 = vadd.f32 %v597_v43, %v171_v49 }
  0xd7   :  { %v176_v54 = vsel %vm175_vm2, %v597_v43, %v172_v51 }
  0xd8   :  { %v181_v55 = vsel %vm178_vm3, %v180_v52, %v176_v54 }
  0xd9   :  { %v182_v56 = vmul.f32 %v181_v55, %v157_v53 }
  0xdb   :  { %v494_v57 = vclamps-f32 %v182_v56, 1.0 }
  0xdd   :  { %v185_v59 = vadd.f32 1.0, %v494_v57 }
  0xdf   :  { %v186_v60 = vmul.f32 %v185_v59, %v143_v58 }
  0xe1   :  { %v187_v61 = vpack.c.bf16 %v186_v60, %v186_v60 }
  0xe3   :  { %266 = vmatmul.bf16.vlgmr.msra.gmra.mxu1 %v187_v61 }
 0x160   :  { %v267_v2 = vpop.f32.mrf.mxu1 }
 0x161   :  { %v268_v3 = vadd.f32 %v594_v0, %v267_v2 }
 0x163   :  { %v272_v5 = vmul.f32 0.70710677, %v268_v3  ;;  %v271_v46 = vmul.f32 0.5, %v268_v3 }
 0x165   :  { %v273_v6 = vmul.f32 %v272_v5, %v272_v5 }
 0x167   :  { %v274_v8 = vmin.f32 %v273_v6, 16.0 }
 0x168   :  { %v269_v9 = vpop.f32.mrf.mxu1 }
 0x169   :  { %v275_v10 = vmul.f32 2.1237322e-06, %v274_v8  ;;  %v286_v11 = vmul.f32 3.8918573e-05, %v274_v8 }
 0x16b   :  { %v276_v13 = vadd.f32 0.00028619796, %v275_v10  ;;  %v287_v14 = vadd.f32 0.001143296, %v286_v11 }
 0x16d   :  { %v277_v15 = vmul.f32 %v276_v13, %v274_v8  ;;  %v288_v16 = vmul.f32 %v287_v14, %v274_v8 }
 0x16f   :  { %v289_v18 = vadd.f32 0.014752088, %v288_v16  ;;  %v278_v19 = vadd.f32 0.0036580483, %v277_v15 }
 0x171   :  { %v290_v20 = vmul.f32 %v289_v18, %v274_v8  ;;  %v279_v23 = vmul.f32 %v278_v19, %v274_v8 }
 0x173   :  { %v291_v22 = vadd.f32 0.112945676, %v290_v20  ;;  %v280_v26 = vadd.f32 0.05243302, %v279_v23 }
 0x175   :  { %v292_v24 = vmul.f32 %v291_v22, %v274_v8  ;;  %v281_v29 = vmul.f32 %v280_v26, %v274_v8 }
 0x177   :  { %v293_v25 = vadd.f32 0.4994258, %v292_v24  ;;  %v282_v30 = vadd.f32 0.18741608, %v281_v29 }
 0x179   :  { %v294_v27 = vmul.f32 %v293_v25, %v274_v8  ;;  %v283_v32 = vmul.f32 %v282_v30, %v274_v8 }
 0x17b   :  { %v295_v28 = vadd.f32 1.0, %v294_v27  ;;  %v284_v36 = vadd.f32 1.1283791, %v283_v32 }
 0x17d   :  { %598 = vrcp.f32 %v295_v28  ;;  %v307_v35 = vand.u32 2147483648, %v295_v28  ;;  %v305_v38 = vand.u32 2147483647, %v295_v28  ;;  %vm301_vm5 = vweird.f32 %v295_v28 }
 0x17e   :  { %v285_v41 = vmul.f32 %v284_v36, %v272_v5 }
 0x17f   :  { %v308_v40 = vor.u32 1.1754944e-38, %v307_v35  ;;  %vm306_vm7 = vcmp.eq.f32.partialorder %v305_v38, 8.507059e+37 }
 0x183   :  { %v599_v31 = vpop.eup %598 }
 0x184   :  { %v297_v33 = vmul.f32 %v599_v31, %v295_v28  ;;  %vm302_vm4 = vweird.f32 %v599_v31 }
 0x185   :  { %vm303_vm6 = vmor %vm301_vm5, %vm302_vm4 }
 0x186   :  { %v298_v34 = vsub.f32 1.0, %v297_v33 }
 0x188   :  { %v299_v37 = vmul.f32 %v599_v31, %v298_v34 }
 0x18a   :  { %v300_v39 = vadd.f32 %v599_v31, %v299_v37 }
 0x18c   :  { %v304_v42 = vsel %vm303_vm6, %v599_v31, %v300_v39 }
 0x18d   :  { %v309_v43 = vsel %vm306_vm7, %v308_v40, %v304_v42 }
 0x18e   :  { %v310_v44 = vmul.f32 %v309_v43, %v285_v41 }
 0x190   :  { %v527_v45 = vclamps-f32 %v310_v44, 1.0 }
 0x192   :  { %v313_v47 = vadd.f32 1.0, %v527_v45 }
 0x194   :  { %v314_v48 = vmul.f32 %v313_v47, %v271_v46 }
 0x196   :  { %v315_v49 = vpack.c.bf16 %v314_v48, %v314_v48 }
 0x198   :  { %394 = vmatmul.bf16.vlgmr.msra.gmra.mxu2 %v315_v49 }
 0x21b   :  { %v395_v51 = vpop.f32.mrf.mxu2 }
 0x21c   :  { %v396_v52 = vadd.f32 %v595_v50, %v395_v51 }
 0x21e   :  { %v400_v53 = vmul.f32 0.70710677, %v396_v52  ;;  %v399_v26 = vmul.f32 0.5, %v396_v52 }
 0x220   :  { %v401_v54 = vmul.f32 %v400_v53, %v400_v53 }
 0x222   :  { %v402_v55 = vmin.f32 %v401_v54, 16.0 }
 0x223   :  { %v397_v56 = vpop.f32.mrf.mxu2 }
 0x224   :  { %v403_v57 = vmul.f32 2.1237322e-06, %v402_v55  ;;  %v414_v58 = vmul.f32 3.8918573e-05, %v402_v55 }
 0x226   :  { %v404_v59 = vadd.f32 0.00028619796, %v403_v57  ;;  %v415_v60 = vadd.f32 0.001143296, %v414_v58 }
 0x228   :  { %v405_v61 = vmul.f32 %v404_v59, %v402_v55  ;;  %v416_v62 = vmul.f32 %v415_v60, %v402_v55 }
 0x22a   :  { %v417_v63 = vadd.f32 0.014752088, %v416_v62  ;;  %v406_v0 = vadd.f32 0.0036580483, %v405_v61 }
 0x22c   :  { %v418_v1 = vmul.f32 %v417_v63, %v402_v55  ;;  %v407_v3 = vmul.f32 %v406_v0, %v402_v55 }
 0x22e   :  { %v419_v2 = vadd.f32 0.112945676, %v418_v1  ;;  %v408_v6 = vadd.f32 0.05243302, %v407_v3 }
 0x230   :  { %v420_v4 = vmul.f32 %v419_v2, %v402_v55  ;;  %v409_v9 = vmul.f32 %v408_v6, %v402_v55 }
 0x232   :  { %v421_v5 = vadd.f32 0.4994258, %v420_v4  ;;  %v410_v10 = vadd.f32 0.18741608, %v409_v9 }
 0x234   :  { %v422_v7 = vmul.f32 %v421_v5, %v402_v55  ;;  %v411_v12 = vmul.f32 %v410_v10, %v402_v55 }
 0x236   :  { %v423_v8 = vadd.f32 1.0, %v422_v7  ;;  %v412_v16 = vadd.f32 1.1283791, %v411_v12 }
 0x238   :  { %600 = vrcp.f32 %v423_v8  ;;  %v435_v15 = vand.u32 2147483648, %v423_v8  ;;  %v433_v18 = vand.u32 2147483647, %v423_v8  ;;  %vm429_vm9 = vweird.f32 %v423_v8 }
 0x239   :  { %v413_v21 = vmul.f32 %v412_v16, %v400_v53 }
 0x23a   :  { %v436_v20 = vor.u32 1.1754944e-38, %v435_v15  ;;  %vm434_vm11 = vcmp.eq.f32.partialorder %v433_v18, 8.507059e+37 }
 0x23e   :  { %v601_v11 = vpop.eup %600 }
 0x23f   :  { %v425_v13 = vmul.f32 %v601_v11, %v423_v8  ;;  %vm430_vm8 = vweird.f32 %v601_v11 }
 0x240   :  { %vm431_vm10 = vmor %vm429_vm9, %vm430_vm8 }
 0x241   :  { %v426_v14 = vsub.f32 1.0, %v425_v13 }
 0x243   :  { %v427_v17 = vmul.f32 %v601_v11, %v426_v14 }
 0x245   :  { %v428_v19 = vadd.f32 %v601_v11, %v427_v17 }
 0x247   :  { %v432_v22 = vsel %vm431_vm10, %v601_v11, %v428_v19 }
 0x248   :  { %v437_v23 = vsel %vm434_vm11, %v436_v20, %v432_v22 }
 0x249   :  { %v438_v24 = vmul.f32 %v437_v23, %v413_v21 }
 0x24b   :  { %v560_v25 = vclamps-f32 %v438_v24, 1.0 }
 0x24d   :  { %v441_v27 = vadd.f32 1.0, %v560_v25 }
 0x24f   :  { %v442_v28 = vmul.f32 %v441_v27, %v399_v26 }
 0x251   :  { %443 = vst [vmem:[#allocation8] sm:$0xff] %v442_v28 }
 0x252   :  { %454 = dma.vmem_to_hbm [thread:$0]  %s450_s2, 128, %s452_s5, [#allocation4]  }
 0x253   :  { %702 = dma.done.wait [#allocation4], 128  }
 0x254   :  { %703 = vsyncadd [#allocation4], 4294967168 }
 0x255   :  { %459 = vsyncpa [#allocation3], 1 }
 0x256   :  { %460 = vsyncpa [#allocation6], 1 }
 0x257   :  { %461 = vsyncpa [#allocation4], 1 }

</bundles_post_ra>
